<compile_context>
chip_gen: v5e
topology: v5e:2x2
jax: 0.10.0
libtpu: 0.0.40
codegen_flags: <defaults>
</compile_context>

<pallas_src>
import functools

import jax
import jax.numpy as jnp
from jax import lax
from jax.experimental import pallas as pl
from jax.experimental.pallas import tpu as pltpu


def _round_up(x: int, m: int) -> int:
    return ((x + m - 1) // m) * m


def _attention_kernel(h_ref, enc_ref, w_t_ref, b_ref, out_ref, *, seq_len: int):
    """Single-program attention. All operands are VMEM-resident, padded tiles.

    h_ref   : (Mp, Hp)  queries (rows >= real B are zero padding)
    enc_ref : (Sp, Hp)  encoder hiddens (rows >= seq_len are zero padding)
    w_t_ref : (Hp, Hp)  proj weight, pre-transposed (W^T)
    b_ref   : (1,  Hp)  proj bias
    out_ref : (Mp, Hp)  attention output
    """
    enc = enc_ref[...]                                                   # (Sp, Hp)

    # proj(encoder_hiddens) = enc @ W^T + b            -> (Sp, Hp)
    proj = jnp.dot(enc, w_t_ref[...],
                   preferred_element_type=jnp.float32) + b_ref[...]

    # scores[m, s] = sum_h h[m, h] * proj[s, h]  (contract H on both operands;
    # no explicit transpose of proj is materialized).
    scores = lax.dot_general(
        h_ref[...], proj,
        dimension_numbers=(((1,), (1,)), ((), ())),
        preferred_element_type=jnp.float32)                              # (Mp, Sp)

    # Mask padded key lanes (s >= seq_len) before the softmax.
    col = lax.broadcasted_iota(jnp.int32, scores.shape, 1)
    scores = jnp.where(col < seq_len, scores, jnp.finfo(jnp.float32).min)

    # Numerically-stable softmax over the key axis; divide on the EUP.
    s_max = jnp.max(scores, axis=1, keepdims=True)
    e = jnp.exp(scores - s_max)
    denom = jnp.sum(e, axis=1, keepdims=True)
    dist = e * pl.reciprocal(denom, approx=True)                         # (Mp, Sp)

    # output = dist @ encoder_hiddens                   -> (Mp, Hp)
    out_ref[...] = jnp.dot(dist, enc, preferred_element_type=jnp.float32)


def attention_forward(hidden, encoder_hiddens, proj_w, proj_b):
    """hidden: (1, B, H) f32, encoder_hiddens: (S, H) f32,
    proj_w: (H, H) f32 (PyTorch Linear weight), proj_b: (H,) f32.
    Returns (B, H) attention output (matches the PyTorch module)."""
    h = hidden[0]                                    # (B, H)
    B, H = h.shape
    S = encoder_hiddens.shape[0]

    # Pad to TPU-friendly tile sizes: sublanes multiple of 8, lanes multiple of 128.
    Mp = _round_up(max(B, 8), 8)
    Hp = _round_up(H, 128)
    Sp = _round_up(S, 128)

    h_p = jnp.zeros((Mp, Hp), jnp.float32).at[:B, :H].set(h)
    enc_p = jnp.zeros((Sp, Hp), jnp.float32).at[:S, :H].set(encoder_hiddens)
    w_t_p = jnp.zeros((Hp, Hp), jnp.float32).at[:H, :H].set(proj_w.T)
    b_p = jnp.zeros((1, Hp), jnp.float32).at[0, :H].set(proj_b)

    kernel = functools.partial(_attention_kernel, seq_len=S)
    vmem = pl.BlockSpec(memory_space=pltpu.MemorySpace.VMEM)

    cost = pl.CostEstimate(
        flops=2 * Sp * Hp * Hp + 2 * Mp * Sp * Hp + 2 * Mp * Sp * Hp,
        transcendentals=Mp * Sp + Mp,
        bytes_accessed=4 * (Mp * Hp + Sp * Hp + Hp * Hp + Hp + Mp * Hp),
    )

    out_p = pl.pallas_call(
        kernel,
        out_shape=jax.ShapeDtypeStruct((Mp, Hp), jnp.float32),
        in_specs=[vmem, vmem, vmem, vmem],
        out_specs=vmem,
        cost_estimate=cost,
    )(h_p, enc_p, w_t_p, b_p)

    return out_p[:B, :H]


def _reference_forward(hidden, encoder_hiddens, proj_w, proj_b):
    """Pure-JAX reference mirroring the PyTorch module."""
    h = hidden[0]
    proj = encoder_hiddens @ proj_w.T + proj_b
    scores = h @ proj.T
    dist = jax.nn.softmax(scores, axis=1)
    return dist @ encoder_hiddens


if __name__ == "__main__":
    HIDDEN = 32     # hidden_size
    SEQ = 8         # number of encoder hidden states
    BATCH = 1       # decoder works one query at a time (hidden is (1, 1, H))

    key = jax.random.PRNGKey(0)
    k_h, k_e, k_w, k_b = jax.random.split(key, 4)
    scale = 0.1

    hidden = scale * jax.random.normal(k_h, (1, BATCH, HIDDEN), jnp.float32)
    encoder_hiddens = scale * jax.random.normal(k_e, (SEQ, HIDDEN), jnp.float32)
    proj_w = scale * jax.random.normal(k_w, (HIDDEN, HIDDEN), jnp.float32)
    proj_b = scale * jax.random.normal(k_b, (HIDDEN,), jnp.float32)

    out = attention_forward(hidden, encoder_hiddens, proj_w, proj_b)
    out = jax.block_until_ready(out)

    ref = _reference_forward(hidden, encoder_hiddens, proj_w, proj_b)

    assert out.shape == (BATCH, HIDDEN), out.shape
    # approx reciprocal (EUP) gives ~1e-4 relative error on the softmax denom.
    assert jnp.allclose(out, ref, atol=1e-3, rtol=1e-3), float(
        jnp.max(jnp.abs(out - ref)))

    print("KERNEL_OK")
</pallas_src>

<mosaic_0001>
module attributes {stable_mosaic.version = 11 : i64} {
  func.func @_attention_kernel(%arg0: memref<8x128xf32, #tpu.memory_space<vmem>>, %arg1: memref<128x128xf32, #tpu.memory_space<vmem>>, %arg2: memref<128x128xf32, #tpu.memory_space<vmem>>, %arg3: memref<1x128xf32, #tpu.memory_space<vmem>>, %arg4: memref<8x128xf32, #tpu.memory_space<vmem>>) attributes {dimension_semantics = [], scalar_prefetch = 0 : i64, scratch_operands = 0 : i64, tpu.core_type = #tpu.core_type<tc>} {
    %c0 = arith.constant 0 : index
    %c0_0 = arith.constant 0 : index
    %0 = vector.load %arg1[%c0, %c0_0] : memref<128x128xf32, #tpu.memory_space<vmem>>, vector<128x128xf32>
    %c0_1 = arith.constant 0 : index
    %c0_2 = arith.constant 0 : index
    %1 = vector.load %arg2[%c0_1, %c0_2] : memref<128x128xf32, #tpu.memory_space<vmem>>, vector<128x128xf32>
    %cst = arith.constant dense<0.000000e+00> : vector<128x128xf32>
    %2 = tpu.matmul %0, %1, %cst {dimension_numbers = #tpu.dot_dimension_numbers<[1], [0], [0], [1], [0, 0, 1, 1], [], []>} : vector<128x128xf32>, vector<128x128xf32>, vector<128x128xf32> -> vector<128x128xf32>
    %c0_3 = arith.constant 0 : index
    %c0_4 = arith.constant 0 : index
    %3 = vector.load %arg3[%c0_3, %c0_4] : memref<1x128xf32, #tpu.memory_space<vmem>>, vector<1x128xf32>
    %4 = vector.broadcast %3 : vector<1x128xf32> to vector<128x128xf32>
    %5 = arith.addf %2, %4 : vector<128x128xf32>
    %c0_5 = arith.constant 0 : index
    %c0_6 = arith.constant 0 : index
    %6 = vector.load %arg0[%c0_5, %c0_6] : memref<8x128xf32, #tpu.memory_space<vmem>>, vector<8x128xf32>
    %cst_7 = arith.constant dense<0.000000e+00> : vector<8x128xf32>
    %7 = tpu.matmul %6, %5, %cst_7 {dimension_numbers = #tpu.dot_dimension_numbers<[1], [1], [0], [0], [0, 0, 1, 0], [], []>} : vector<8x128xf32>, vector<128x128xf32>, vector<8x128xf32> -> vector<8x128xf32>
    %8 = tpu.iota {dimensions = array<i32: 1>} : vector<8x128xi32>
    %c8_i32 = arith.constant 8 : i32
    %9 = vector.broadcast %c8_i32 : i32 to vector<8x128xi32>
    %10 = arith.cmpi slt, %8, %9 : vector<8x128xi32>
    %cst_8 = arith.constant -3.40282347E+38 : f32
    %11 = vector.broadcast %cst_8 : f32 to vector<8x128xf32>
    %12 = arith.select %10, %7, %11 : vector<8x128xi1>, vector<8x128xf32>
    %cst_9 = arith.constant dense<0xFF800000> : vector<8xf32>
    %13 = vector.multi_reduction <maximumf>, %12, %cst_9 [1] : vector<8x128xf32> to vector<8xf32>
    %14 = vector.shape_cast %13 : vector<8xf32> to vector<8x1xf32>
    %15 = vector.broadcast %14 : vector<8x1xf32> to vector<8x128xf32>
    %16 = arith.subf %12, %15 : vector<8x128xf32>
    %17 = math.exp %16 : vector<8x128xf32>
    %cst_10 = arith.constant dense<0.000000e+00> : vector<8xf32>
    %18 = vector.multi_reduction <add>, %17, %cst_10 [1] : vector<8x128xf32> to vector<8xf32>
    %19 = vector.shape_cast %18 : vector<8xf32> to vector<8x1xf32>
    %20 = tpu.reciprocal %19 {approx = true} : vector<8x1xf32> -> vector<8x1xf32>
    %21 = vector.broadcast %20 : vector<8x1xf32> to vector<8x128xf32>
    %22 = arith.mulf %17, %21 : vector<8x128xf32>
    %cst_11 = arith.constant dense<0.000000e+00> : vector<8x128xf32>
    %23 = tpu.matmul %22, %0, %cst_11 {dimension_numbers = #tpu.dot_dimension_numbers<[1], [0], [0], [1], [0, 0, 1, 1], [], []>} : vector<8x128xf32>, vector<128x128xf32>, vector<8x128xf32> -> vector<8x128xf32>
    %c0_12 = arith.constant 0 : index
    %c0_13 = arith.constant 0 : index
    %24 = vector.load %arg4[%c0_12, %c0_13] : memref<8x128xf32, #tpu.memory_space<vmem>>, vector<8x128xf32>
    tpu.vector_store %arg4[%c0_12, %c0_13], %23 {strides = array<i32>} : memref<8x128xf32, #tpu.memory_space<vmem>>, vector<8x128xf32>,
    return
  }
}

</mosaic_0001>

<bundles_post_ra>
// kernel: tpu_custom_call.1
= control target key start
LH: loop header
LB: loop body
LE: loop exit
PB: predicated region body
PF: predicated region fallthrough
CT: control target
= control target key end

     0   :  { %9 = vsyncpa [#allocation3], 0  ;;  %s428_s0 = inlined_call_operand.hbm [shape: f32[8,128], index: 0, kind: input, shape index: {}]   ;;  %s429_s1 = inlined_call_operand.hbm [shape: f32[128,128], index: 1, kind: input, shape index: {}]   ;;  %s430_s2 = inlined_call_operand.hbm [shape: f32[128,128], index: 2, kind: input, shape index: {}]   ;;  %s431_s3 = inlined_call_operand.vmem [shape: f32[1,128], index: 3, kind: input, shape index: {}]   ;;  %s432_s4 = inlined_call_operand.hbm [shape: f32[8,128], index: 4, kind: output, shape index: {}]  }
   0x1   :  { %10 = vsyncpa [#allocation6], 0  ;;  %s27_s17 = sshll.u32 %s429_s1, 4  ;;  %s28_s17 = int_to_ptr.hbm [resolvable:$true] %s27_s17 }
   0x2   :  { %11 = vsyncpa [#allocation4], 0  ;;  %s382_s18 = smov [#allocation5]   ;;  %s17_s22 = sshll.u32 %s428_s0, 4  ;;  %s18_s22 = int_to_ptr.hbm [resolvable:$true] %s17_s22 }
   0x3   :  { %s29_s19 = sshll.u32 %s382_s18, 4  ;;  %s383_s23 = smov 128   ;;  %s30_s19 = int_to_ptr.vmem [resolvable:$true] %s29_s19 }
   0x4   :  { %s384_s24 = smov 8   ;;  %s385_s25 = smov [#allocation2]  }
   0x5   :  { %35 = dma.hbm_to_vmem [thread:$0]  %s28_s17, 2048, %s30_s19, [#allocation6], %s383_s23, %s383_s23, %s384_s24  }
   0x6   :  { %s19_s26 = sshll.u32 %s385_s25, 4  ;;  %s40_s29 = sshll.u32 %s430_s2, 4  ;;  %s20_s26 = int_to_ptr.vmem [resolvable:$true] %s19_s26  ;;  %s41_s29 = int_to_ptr.hbm [resolvable:$true] %s40_s29 }
   0x7   :  { %22 = dma.hbm_to_vmem [thread:$0]  %s18_s22, 128, %s20_s26, [#allocation3]  }
   0x8   :  { %s386_s1 = smov [#allocation7]  }
   0x9   :  { %s42_s30 = sshll.u32 %s386_s1, 4  ;;  %s43_s30 = int_to_ptr.vmem [resolvable:$true] %s42_s30 }
   0xa   :  { %48 = dma.hbm_to_vmem [thread:$0]  %s41_s29, 2048, %s43_s30, [#allocation6], %s383_s23, %s383_s23, %s384_s24  }
   0xb   :  { %376 = dma.done.wait [#allocation3], 128  }
   0xc   :  { %377 = vsyncadd [#allocation3], 4294967168 }
   0xd   :  { %378 = dma.done.wait [#allocation6], 4096  }
   0xe   :  { %379 = vsyncadd [#allocation6], 4294963200  ;;  %v94_v0 = vld [vmem:[#allocation7 + $0x78] sm:$0xff]  ;;  %v93_v1 = vld [vmem:[#allocation7 + $0x70] sm:$0xff]  ;;  %s226_s8 = sshll.u32 %s432_s4, 4  ;;  %s227_s8 = int_to_ptr.hbm [resolvable:$true] %s226_s8 }
   0xf   :  { %238 = vmatpush.msra.mxu3 %v94_v0  ;;  %237 = vmatpush.msra.mxu2 %v94_v0  ;;  %v92_v2 = vld [vmem:[#allocation7 + $0x68] sm:$0xff]  ;;  %v91_v3 = vld [vmem:[#allocation7 + $0x60] sm:$0xff]  ;;  %v90_v4 = vld [vmem:[#allocation7 + $0x58] sm:$0xff] }
  0x10   :  { %99 = vmatpush.msra.mxu0 %v94_v0  ;;  %v89_v5 = vld [vmem:[#allocation7 + $0x50] sm:$0xff]  ;;  %v88_v6 = vld [vmem:[#allocation7 + $0x48] sm:$0xff]  ;;  %v87_v7 = vld [vmem:[#allocation7 + $0x40] sm:$0xff] }
  0x11   :  { %240 = vmatpush.msra.mxu3 %v93_v1  ;;  %239 = vmatpush.msra.mxu2 %v93_v1  ;;  %v86_v8 = vld [vmem:[#allocation7 + $0x38] sm:$0xff]  ;;  %v85_v9 = vld [vmem:[#allocation7 + $0x30] sm:$0xff]  ;;  %v84_v10 = vld [vmem:[#allocation7 + $0x28] sm:$0xff] }
  0x12   :  { %100 = vmatpush.msra.mxu0 %v93_v1  ;;  %v83_v11 = vld [vmem:[#allocation7 + $0x20] sm:$0xff]  ;;  %v82_v12 = vld [vmem:[#allocation7 + $0x18] sm:$0xff]  ;;  %v81_v13 = vld [vmem:[#allocation7 + $0x10] sm:$0xff] }
  0x13   :  { %242 = vmatpush.msra.mxu3 %v92_v2  ;;  %241 = vmatpush.msra.mxu2 %v92_v2  ;;  %v80_v14 = vld [vmem:[#allocation7 + $0x8] sm:$0xff]  ;;  %v79_v15 = vld [vmem:[#allocation7] sm:$0xff]  ;;  %v73_v16 = vld [vmem:[#allocation5 + $0x50] sm:$0xff] }
  0x14   :  { %101 = vmatpush.msra.mxu0 %v92_v2  ;;  %v69_v17 = vld [vmem:[#allocation5 + $0x30] sm:$0xff]  ;;  %v78_v18 = vld [vmem:[#allocation5 + $0x78] sm:$0xff]  ;;  %v76_v21 = vld [vmem:[#allocation5 + $0x68] sm:$0xff]  ;;  %v185_v2 = vlaneseq }
  0x15   :  { %244 = vmatpush.msra.mxu3 %v91_v3  ;;  %243 = vmatpush.msra.mxu2 %v91_v3  ;;  %v77_v19 = vld [vmem:[#allocation5 + $0x70] sm:$0xff]  ;;  %v74_v20 = vld [vmem:[#allocation5 + $0x58] sm:$0xff]  ;;  %v75_v22 = vld [vmem:[#allocation5 + $0x60] sm:$0xff] }
  0x16   :  { %102 = vmatpush.msra.mxu0 %v91_v3  ;;  %v63_v23 = vld [vmem:[#allocation5] sm:$0xff]  ;;  %v70_v24 = vld [vmem:[#allocation5 + $0x38] sm:$0xff]  ;;  %v72_v25 = vld [vmem:[#allocation5 + $0x48] sm:$0xff]  ;;  %v186_v3 = vand.u32 127, %v185_v2 }
  0x17   :  { %246 = vmatpush.msra.mxu3 %v90_v4  ;;  %245 = vmatpush.msra.mxu2 %v90_v4  ;;  %v64_v26 = vld [vmem:[#allocation5 + $0x8] sm:$0xff]  ;;  %v71_v27 = vld [vmem:[#allocation5 + $0x40] sm:$0xff]  ;;  %v65_v29 = vld [vmem:[#allocation5 + $0x10] sm:$0xff] }
  0x18   :  { %103 = vmatpush.msra.mxu0 %v90_v4  ;;  %v68_v28 = vld [vmem:[#allocation5 + $0x28] sm:$0xff]  ;;  %v67_v30 = vld [vmem:[#allocation5 + $0x20] sm:$0xff]  ;;  %v66_v31 = vld [vmem:[#allocation5 + $0x18] sm:$0xff]  ;;  %vm187_vm0 = vcmp.lt.s32.totalorder %v186_v3, 8 }
  0x19   :  { %248 = vmatpush.msra.mxu3 %v89_v5  ;;  %247 = vmatpush.msra.mxu2 %v89_v5  ;;  %v275_v40 = vld [vmem:[%s431_s3] ss:$0 sm:$0xff]  ;;  %s387_s3 = smov [#allocation8]  }
  0x1a   :  { %104 = vmatpush.msra.mxu0 %v89_v5  ;;  %v164_v1 = vld [vmem:[#allocation2] sm:$0xff]  ;;  %s224_s5 = sshll.u32 %s387_s3, 4  ;;  %s225_s5 = int_to_ptr.vmem [resolvable:$true] %s224_s5 }
  0x1b   :  { %250 = vmatpush.msra.mxu3 %v88_v6  ;;  %249 = vmatpush.msra.mxu2 %v88_v6 }
  0x1c   :  { %105 = vmatpush.msra.mxu0 %v88_v6 }
  0x1d   :  { %252 = vmatpush.msra.mxu3 %v87_v7  ;;  %251 = vmatpush.msra.mxu2 %v87_v7 }
  0x1e   :  { %106 = vmatpush.msra.mxu0 %v87_v7 }
  0x1f   :  { %254 = vmatpush.msra.mxu3 %v86_v8  ;;  %253 = vmatpush.msra.mxu2 %v86_v8 }
  0x20   :  { %107 = vmatpush.msra.mxu0 %v86_v8 }
  0x21   :  { %256 = vmatpush.msra.mxu3 %v85_v9  ;;  %255 = vmatpush.msra.mxu2 %v85_v9 }
  0x22   :  { %108 = vmatpush.msra.mxu0 %v85_v9 }
  0x23   :  { %258 = vmatpush.msra.mxu3 %v84_v10  ;;  %257 = vmatpush.msra.mxu2 %v84_v10 }
  0x24   :  { %109 = vmatpush.msra.mxu0 %v84_v10 }
  0x25   :  { %260 = vmatpush.msra.mxu3 %v83_v11  ;;  %259 = vmatpush.msra.mxu2 %v83_v11 }
  0x26   :  { %110 = vmatpush.msra.mxu0 %v83_v11 }
  0x27   :  { %262 = vmatpush.msra.mxu3 %v82_v12  ;;  %261 = vmatpush.msra.mxu2 %v82_v12 }
  0x28   :  { %111 = vmatpush.msra.mxu0 %v82_v12 }
  0x29   :  { %264 = vmatpush.msra.mxu3 %v81_v13  ;;  %263 = vmatpush.msra.mxu2 %v81_v13 }
  0x2a   :  { %112 = vmatpush.msra.mxu0 %v81_v13 }
  0x2b   :  { %266 = vmatpush.msra.mxu3 %v80_v14  ;;  %265 = vmatpush.msra.mxu2 %v80_v14 }
  0x2c   :  { %113 = vmatpush.msra.mxu0 %v80_v14 }
  0x2d   :  { %268 = vmatpush.msra.mxu3 %v79_v15  ;;  %267 = vmatpush.msra.mxu2 %v79_v15 }
  0x2e   :  { %145 = vmatmul.f32.vlgmr.msra.gmra.mxu3 %v73_v16  ;;  %114 = vmatpush.msra.mxu0 %v79_v15 }
  0x2f   :  { %133 = vmatmul.f32.vlgmr.msra.gmra.mxu2 %v69_v17  ;;  %115 = vmatmul.f32.vlgmr.msra.gmra.mxu0 %v63_v23 }
  0x30   :  { %198 = vmatpush.msrb.mxu2 %v78_v18 }
  0x32   :  { %199 = vmatpush.msrb.mxu2 %v77_v19 }
  0x34   :  { %200 = vmatpush.msrb.mxu2 %v76_v21 }
  0x36   :  { %148 = vmatmul.f32.gmra.mxu3 %v74_v20  ;;  %201 = vmatpush.msrb.mxu2 %v75_v22 }
  0x37   :  { %136 = vmatmul.f32.gmra.mxu2 %v70_v24  ;;  %118 = vmatmul.f32.gmra.mxu0 %v64_v26 }
  0x38   :  { %202 = vmatpush.msrb.mxu2 %v74_v20 }
  0x3a   :  { %203 = vmatpush.msrb.mxu2 %v73_v16 }
  0x3c   :  { %204 = vmatpush.msrb.mxu2 %v72_v25 }
  0x3e   :  { %151 = vmatmul.f32.gmra.mxu3 %v75_v22  ;;  %205 = vmatpush.msrb.mxu2 %v71_v27 }
  0x3f   :  { %139 = vmatmul.f32.gmra.mxu2 %v71_v27  ;;  %121 = vmatmul.f32.gmra.mxu0 %v65_v29 }
  0x40   :  { %206 = vmatpush.msrb.mxu2 %v70_v24 }
  0x42   :  { %207 = vmatpush.msrb.mxu2 %v69_v17 }
  0x44   :  { %208 = vmatpush.msrb.mxu2 %v68_v28 }
  0x46   :  { %154 = vmatmul.f32.gmra.mxu3 %v76_v21  ;;  %209 = vmatpush.msrb.mxu2 %v67_v30 }
  0x47   :  { %142 = vmatmul.f32.gmra.mxu2 %v72_v25  ;;  %124 = vmatmul.f32.gmra.mxu0 %v66_v31 }
  0x48   :  { %210 = vmatpush.msrb.mxu2 %v66_v31 }
  0x4a   :  { %211 = vmatpush.msrb.mxu2 %v65_v29 }
  0x4c   :  { %212 = vmatpush.msrb.mxu2 %v64_v26 }
  0x4e   :  { %157 = vmatmul.f32.gmra.mxu3 %v77_v19  ;;  %213 = vmatpush.msrb.mxu2 %v63_v23 }
  0x4f   :  { %127 = vmatmul.f32.gmra.mxu0 %v67_v30 }
  0x56   :  { %160 = vmatmul.f32.gmra.mxu3 %v78_v18 }
  0x57   :  { %130 = vmatmul.f32.gmra.mxu0 %v68_v28 }
  0xac   :  { %v116_v36 = vpop.f32.mrf.mxu0 }
  0xad   :  { %v117_v0 = vadd.f32 %v275_v40, %v116_v36 }
  0xb1   :  { %v146_v32 = vpop.f32.mrf.mxu3 }
  0xb2   :  { %v134_v37 = vpop.f32.mrf.mxu2  ;;  %v147_v52 = vadd.f32 %v275_v40, %v146_v32 }
  0xb3   :  { %v135_v58 = vadd.f32 %v275_v40, %v134_v37 }
  0xb4   :  { %v119_v39 = vpop.f32.mrf.mxu0 }
  0xb5   :  { %v120_v63 = vadd.f32 %v275_v40, %v119_v39 }
  0xb9   :  { %v149_v33 = vpop.f32.mrf.mxu3 }
  0xba   :  { %v137_v42 = vpop.f32.mrf.mxu2  ;;  %v150_v50 = vadd.f32 %v275_v40, %v149_v33 }
  0xbb   :  { %v138_v56 = vadd.f32 %v275_v40, %v137_v42 }
  0xbc   :  { %v122_v45 = vpop.f32.mrf.mxu0 }
  0xbd   :  { %v123_v62 = vadd.f32 %v275_v40, %v122_v45 }
  0xc1   :  { %v152_v34 = vpop.f32.mrf.mxu3 }
  0xc2   :  { %v140_v47 = vpop.f32.mrf.mxu2  ;;  %v153_v48 = vadd.f32 %v275_v40, %v152_v34 }
  0xc3   :  { %v141_v55 = vadd.f32 %v275_v40, %v140_v47 }
  0xc4   :  { %v125_v49 = vpop.f32.mrf.mxu0 }
  0xc5   :  { %v126_v61 = vadd.f32 %v275_v40, %v125_v49 }
  0xc9   :  { %v155_v35 = vpop.f32.mrf.mxu3 }
  0xca   :  { %v156_v46 = vadd.f32 %v275_v40, %v155_v35  ;;  %v143_v51 = vpop.f32.mrf.mxu2 }
  0xcb   :  { %v144_v53 = vadd.f32 %v275_v40, %v143_v51 }
  0xcc   :  { %v128_v54 = vpop.f32.mrf.mxu0 }
  0xcd   :  { %v129_v60 = vadd.f32 %v275_v40, %v128_v54 }
  0xd1   :  { %v158_v38 = vpop.f32.mrf.mxu3 }
  0xd2   :  { %v159_v44 = vadd.f32 %v275_v40, %v158_v38 }
  0xd4   :  { %v131_v57 = vpop.f32.mrf.mxu0 }
  0xd5   :  { %v132_v59 = vadd.f32 %v275_v40, %v131_v57 }
  0xd9   :  { %v161_v41 = vpop.f32.mrf.mxu3 }
  0xda   :  { %v162_v43 = vadd.f32 %v275_v40, %v161_v41 }
  0xdc   :  { %165 = vmatpush.xpose.msra.mxu1 %v162_v43 }
  0xe0   :  { %166 = vmatpush.xpose.msra.mxu1 %v159_v44 }
  0xe4   :  { %167 = vmatpush.xpose.msra.mxu1 %v156_v46 }
  0xe8   :  { %168 = vmatpush.xpose.msra.mxu1 %v153_v48 }
  0xec   :  { %169 = vmatpush.xpose.msra.mxu1 %v150_v50 }
  0xf0   :  { %170 = vmatpush.xpose.msra.mxu1 %v147_v52 }
  0xf4   :  { %171 = vmatpush.xpose.msra.mxu1 %v144_v53 }
  0xf8   :  { %172 = vmatpush.xpose.msra.mxu1 %v141_v55 }
  0xfc   :  { %173 = vmatpush.xpose.msra.mxu1 %v138_v56 }
 0x100   :  { %174 = vmatpush.xpose.msra.mxu1 %v135_v58 }
 0x104   :  { %175 = vmatpush.xpose.msra.mxu1 %v132_v59 }
 0x108   :  { %176 = vmatpush.xpose.msra.mxu1 %v129_v60 }
 0x10c   :  { %177 = vmatpush.xpose.msra.mxu1 %v126_v61 }
 0x110   :  { %178 = vmatpush.xpose.msra.mxu1 %v123_v62 }
 0x114   :  { %179 = vmatpush.xpose.msra.mxu1 %v120_v63 }
 0x118   :  { %180 = vmatpush.xpose.msra.mxu1 %v117_v0 }
 0x11b   :  { %181 = vmatmul.f32.vlgmr.msra.gmra.mxu1 %v164_v1 }
 0x198   :  { %v182_v4 = vpop.f32.mrf.mxu1 }
 0x199   :  { %v188_v5 = vsel %vm187_vm0, %v182_v4, -3.4028235e+38 }
 0x19a   :  { %189 = vmax.xlane.f32.xlu0 %v188_v5 }
 0x20d   :  { %v190_v6 = vpop.xlane.xlu0 %189 }
 0x20e   :  { %v191_v7 = vsub.f32 %v188_v5, %v190_v6 }
 0x210   :  { %v192_v8 = vmul.f32 1.442695, %v191_v7 }
 0x212   :  { %276 = vpow2.f32 %v192_v8 }
 0x218   :  { %v277_v9 = vpop.eup %276 }
 0x219   :  { %194 = vadd.xlane.f32.xlu0 %v277_v9 }
 0x28c   :  { %v195_v10 = vpop.xlane.xlu0 %194 }
 0x28d   :  { %278 = vrcp.f32 %v195_v10 }
 0x293   :  { %v279_v11 = vpop.eup %278 }
 0x294   :  { %v197_v12 = vmul.f32 %v279_v11, %v277_v9 }
 0x296   :  { %214 = vmatmul.f32.vlgmr.msrb.gmra.mxu2 %v197_v12 }
 0x319   :  { %v215_v13 = vpop.f32.mrf.mxu2 }
 0x31a   :  { %218 = vst [vmem:[#allocation8] sm:$0xff] %v215_v13 }
 0x31b   :  { %229 = dma.vmem_to_hbm [thread:$0]  %s225_s5, 128, %s227_s8, [#allocation4]  }
 0x31c   :  { %380 = dma.done.wait [#allocation4], 128  }
 0x31d   :  { %381 = vsyncadd [#allocation4], 4294967168 }
 0x31e   :  { %234 = vsyncpa [#allocation3], 1 }
 0x31f   :  { %235 = vsyncpa [#allocation6], 1 }
 0x320   :  { %236 = vsyncpa [#allocation4], 1 }

</bundles_post_ra>
